<compile_context>
chip_gen: v7x
topology: tpu7x:2x2x1
jax: 0.10.0
libtpu: 0.0.40
codegen_flags: <defaults>
</compile_context>

<pallas_src>
import jax
import jax.numpy as jnp
from jax.experimental import pallas as pl
from jax.experimental.pallas import tpu as pltpu


# ----------------------------------------------------------------------------
# Pallas kernel: fused pos+neg partial sums, one batch element per grid step
# ----------------------------------------------------------------------------
def _make_kernel(pointwise: bool, s_real: int, eps: float = 1e-10):
    inv_s = 1.0 / float(s_real)
    s_sq = float(s_real) * float(s_real)
    trans_b = (((1,), (1,)), ((), ()))  # contract lane (pixel) dims: A @ B^T

    def kernel(perm_ref, f1_ref, c1_ref, f2_ref, c2_ref, out_ref):
        del perm_ref  # only consumed by the index_maps (scalar prefetch)
        n = pl.program_id(0)

        def l2norm(x):
            # F.normalize(t, dim=channel, eps): x / max(||x||_2, eps), per pixel.
            nrm = jnp.sqrt(jnp.sum(x * x, axis=0, keepdims=True))   # (1, S)
            return x / jnp.maximum(nrm, eps)

        f1 = l2norm(f1_ref[0].astype(jnp.float32))   # (Cf, S)   feats[n]
        c1 = l2norm(c1_ref[0].astype(jnp.float32))   # (Cc, S)   code[n]
        f2 = l2norm(f2_ref[0].astype(jnp.float32))   # (Cf, S)   feats[perm[n]]
        c2 = l2norm(c2_ref[0].astype(jnp.float32))   # (Cc, S)   code[perm[n]]

        # Per-channel sums over pixels.
        s_f1 = jnp.sum(f1, axis=1, keepdims=True)    # (Cf, 1)
        s_f2 = jnp.sum(f2, axis=1, keepdims=True)
        s_c1 = jnp.sum(c1, axis=1, keepdims=True)    # (Cc, 1)
        s_c2 = jnp.sum(c2, axis=1, keepdims=True)

        # (Cf, Cc) Gram matrices; MXU contraction over K = S pixels.
        g1 = jax.lax.dot_general(f1, c1, trans_b,
                                 preferred_element_type=jnp.float32)
        g2 = jax.lax.dot_general(f2, c2, trans_b,
                                 preferred_element_type=jnp.float32)

        sum_fd_pos = jnp.sum(s_f1 * s_f1)
        sum_fd_neg = jnp.sum(s_f1 * s_f2)
        sum_cd_pos = s_sq - jnp.sum(s_c1 * s_c1)
        sum_cd_neg = s_sq - jnp.sum(s_c1 * s_c2)
        gg_pos = jnp.sum(g1 * g1)                    # <G1, G1>_F
        gg_neg = jnp.sum(g1 * g2)                    # <G1, G2>_F

        if pointwise:
            # fdc[p,q] = f1[p].(f2[q] - mean_q f2)  =>  sum(fdc) == 0 and
            # sum(fdc*cd) = (1/S) * sF2^T G1 sC2 - <G1, G2>_F
            # with sX^T G1 sY = sum_p (sum_a F1[a,p] sX[a]) * (sum_b C1[b,p] sY[b]).
            u_pos = jnp.sum(f1 * s_f1, axis=0, keepdims=True)   # (1, S)
            w_pos = jnp.sum(c1 * s_c1, axis=0, keepdims=True)
            u_neg = jnp.sum(f1 * s_f2, axis=0, keepdims=True)
            w_neg = jnp.sum(c1 * s_c2, axis=0, keepdims=True)
            sum_fdcd_pos = jnp.sum(u_pos * w_pos) * inv_s - gg_pos
            sum_fdcd_neg = jnp.sum(u_neg * w_neg) * inv_s - gg_neg
        else:
            # sum(fd*cd) = sum(fd) - <G1, G2>_F
            sum_fdcd_pos = sum_fd_pos - gg_pos
            sum_fdcd_neg = sum_fd_neg - gg_neg

        # Per-batch partial sums (no cross-step accumulation).
        out_ref[n, 0] = sum_fd_pos
        out_ref[n, 1] = sum_cd_pos
        out_ref[n, 2] = sum_fdcd_pos
        out_ref[n, 3] = sum_fd_neg
        out_ref[n, 4] = sum_cd_neg
        out_ref[n, 5] = sum_fdcd_neg

    return kernel


def _pad_channels(x, mult=8):
    """Zero-pad the channel (sublane) axis of (N, C, S) to a multiple of `mult`.

    Semantics-preserving: zero channels change neither the per-pixel L2 norm
    nor any of the sums / Gram matrices computed in the kernel.
    """
    pad = (-x.shape[1]) % mult
    if pad:
        x = jnp.pad(x, ((0, 0), (0, pad), (0, 0)))
    return x


def _corr_partial_sums(f, c, perm, pointwise, s_real):
    """f: (N, Cf, S), c: (N, Cc, S) float32; perm: (N,) int32. Returns (N, 6)."""
    N, Cf, S = f.shape
    Cc = c.shape[1]
    kernel = _make_kernel(pointwise, s_real)
    return pl.pallas_call(
        kernel,
        out_shape=jax.ShapeDtypeStruct((N, 6), jnp.float32),
        grid_spec=pltpu.PrefetchScalarGridSpec(
            num_scalar_prefetch=1,          # perm lands in SMEM, drives index_maps
            grid=(N,),
            in_specs=[
                pl.BlockSpec((1, Cf, S), lambda n, p: (n, 0, 0)),      # feats[n]
                pl.BlockSpec((1, Cc, S), lambda n, p: (n, 0, 0)),      # code[n]
                pl.BlockSpec((1, Cf, S), lambda n, p: (p[n], 0, 0)),   # feats[perm[n]]
                pl.BlockSpec((1, Cc, S), lambda n, p: (p[n], 0, 0)),   # code[perm[n]]
            ],
            out_specs=pl.BlockSpec(memory_space=pltpu.MemorySpace.SMEM),
        ),
        compiler_params=pltpu.CompilerParams(
            dimension_semantics=("arbitrary",)),
    )(perm, f, c, f, c)


# ----------------------------------------------------------------------------
# Module-equivalent forward
# ----------------------------------------------------------------------------
def contrastive_correlation_loss(orig_feats, orig_code, perm_neg, cfg):
    """orig_feats: (N, Cf, H, W), orig_code: (N, Cc, H, W)  (NCHW, like torch)."""
    N, Cf, H, W = orig_feats.shape
    S = H * W
    pointwise = bool(cfg["pointwise"])

    # NCHW -> (N, C, H*W): pure reshape, pixels land on the lane axis.
    f = _pad_channels(orig_feats.reshape(N, Cf, S).astype(jnp.float32))
    c = _pad_channels(orig_code.reshape(N, orig_code.shape[1], S).astype(jnp.float32))
    perm = perm_neg.astype(jnp.int32)

    sums = _corr_partial_sums(f, c, perm, pointwise, S)   # (N, 6) per-batch partials
    col = jnp.sum(sums, axis=0)                           # reduce over batch in JAX

    total = float(N) * float(S) * float(S)

    def finish(sum_fd, sum_cd, sum_fdcd, shift):
        cd_mean = sum_cd / total
        if pointwise:
            # loss = (fdc - fdc.mean() + fd.mean() - shift) * cd, fdc.mean() == 0.
            k = sum_fd / total - shift
        else:
            k = -shift
        loss_mean = sum_fdcd / total + k * cd_mean
        return loss_mean, cd_mean

    pos_intra_loss, pos_intra_cd = finish(col[0], col[1], col[2],
                                          cfg["pos_intra_shift"])
    neg_inter_loss, neg_inter_cd = finish(col[3], col[4], col[5],
                                          cfg["neg_inter_shift"])
    return pos_intra_loss, pos_intra_cd, neg_inter_loss, neg_inter_cd


# ----------------------------------------------------------------------------
# Pure-JAX reference (mirrors the PyTorch module exactly)
# ----------------------------------------------------------------------------
def _reference(orig_feats, orig_code, perm_neg, cfg):
    def norm(t):
        n = jnp.sqrt(jnp.sum(t * t, axis=1, keepdims=True))
        return t / jnp.maximum(n, 1e-10)

    def tensor_correlation(a, b):
        return jnp.einsum('nchw,ncij->nhwij', a, b)

    def helper(f1, f2, c1, c2, shift):
        fd = tensor_correlation(norm(f1), norm(f2))
        if cfg["pointwise"]:
            old_mean = fd.mean()
            fd = fd - fd.mean(axis=(3, 4), keepdims=True)
            fd = fd - fd.mean() + old_mean
        cd = 1.0 - tensor_correlation(norm(c1), norm(c2))
        loss = (fd - shift) * cd
        return loss.mean(), cd.mean()

    feats_neg = orig_feats[perm_neg]
    code_neg = orig_code[perm_neg]
    pi_l, pi_c = helper(orig_feats, orig_feats, orig_code, orig_code,
                        cfg["pos_intra_shift"])
    ni_l, ni_c = helper(orig_feats, feats_neg, orig_code, code_neg,
                        cfg["neg_inter_shift"])
    return pi_l, pi_c, ni_l, ni_c


# ----------------------------------------------------------------------------
if __name__ == "__main__":
    N, Cf, Cc, H, W = 2, 8, 4, 16, 16
    key = jax.random.PRNGKey(0)
    k_feat, k_code, k_perm = jax.random.split(key, 3)

    orig_feats = jax.random.normal(k_feat, (N, Cf, H, W), dtype=jnp.float32)
    orig_code = jax.random.normal(k_code, (N, Cc, H, W), dtype=jnp.float32)

    # super_perm: random permutation with fixed points bumped by 1 (mod N).
    # (torch.randperm RNG replaced by jax.random on the host side.)
    perm = jax.random.permutation(k_perm, N)
    perm = jnp.where(perm == jnp.arange(N), perm + 1, perm) % N

    names = ["pos_intra_loss", "pos_intra_cd", "neg_inter_loss", "neg_inter_cd"]
    for pointwise in (True, False):
        cfg = dict(pointwise=pointwise,
                   pos_intra_shift=0.18, neg_inter_shift=0.46)

        out = jax.block_until_ready(
            contrastive_correlation_loss(orig_feats, orig_code, perm, cfg))
        ref = jax.block_until_ready(
            _reference(orig_feats, orig_code, perm, cfg))

        for name, a, b in zip(names, out, ref):
            assert jnp.allclose(a, b, rtol=1e-4, atol=2e-5), \
                (pointwise, name, float(a), float(b))

    print("KERNEL_OK")
</pallas_src>

<mosaic_0001>
module attributes {stable_mosaic.version = 11 : i64} {
  func.func @kernel(%arg0: i32, %arg1: memref<2xi32, #tpu.memory_space<smem>>, %arg2: memref<1x8x256xf32, #tpu.memory_space<vmem>>, %arg3: memref<1x8x256xf32, #tpu.memory_space<vmem>>, %arg4: memref<1x8x256xf32, #tpu.memory_space<vmem>>, %arg5: memref<1x8x256xf32, #tpu.memory_space<vmem>>, %arg6: memref<2x6xf32, #tpu.memory_space<smem>>) attributes {dimension_semantics = [#tpu.dimension_semantics<arbitrary>], iteration_bounds = array<i64: 2>, scalar_prefetch = 1 : i64, scratch_operands = 0 : i64, tpu.core_type = #tpu.core_type<tc>, window_params = [{transform_indices = @transform_0, window_bounds = array<i64: 1, 8, 256>}, {transform_indices = @transform_1, window_bounds = array<i64: 1, 8, 256>}, {transform_indices = @transform_2, window_bounds = array<i64: 1, 8, 256>}, {transform_indices = @transform_3, window_bounds = array<i64: 1, 8, 256>}, {transform_indices = @transform_4, window_bounds = array<i64: 2, 6>}]} {
    %c0 = arith.constant 0 : index
    %c0_0 = arith.constant 0 : index
    %c0_1 = arith.constant 0 : index
    %0 = vector.load %arg2[%c0, %c0_0, %c0_1] : memref<1x8x256xf32, #tpu.memory_space<vmem>>, vector<1x8x256xf32>
    %1 = vector.shape_cast %0 : vector<1x8x256xf32> to vector<8x256xf32>
    %2 = arith.mulf %1, %1 : vector<8x256xf32>
    %cst = arith.constant dense<0.000000e+00> : vector<256xf32>
    %3 = vector.multi_reduction <add>, %2, %cst [0] : vector<8x256xf32> to vector<256xf32>
    %4 = vector.shape_cast %3 : vector<256xf32> to vector<1x256xf32>
    %5 = math.sqrt %4 : vector<1x256xf32>
    %cst_2 = arith.constant 1.000000e-10 : f32
    %6 = vector.broadcast %cst_2 : f32 to vector<1x256xf32>
    %7 = arith.maximumf %5, %6 : vector<1x256xf32>
    %8 = vector.broadcast %7 : vector<1x256xf32> to vector<8x256xf32>
    %9 = arith.divf %1, %8 : vector<8x256xf32>
    %c0_3 = arith.constant 0 : index
    %c0_4 = arith.constant 0 : index
    %c0_5 = arith.constant 0 : index
    %10 = vector.load %arg3[%c0_3, %c0_4, %c0_5] : memref<1x8x256xf32, #tpu.memory_space<vmem>>, vector<1x8x256xf32>
    %11 = vector.shape_cast %10 : vector<1x8x256xf32> to vector<8x256xf32>
    %12 = arith.mulf %11, %11 : vector<8x256xf32>
    %cst_6 = arith.constant dense<0.000000e+00> : vector<256xf32>
    %13 = vector.multi_reduction <add>, %12, %cst_6 [0] : vector<8x256xf32> to vector<256xf32>
    %14 = vector.shape_cast %13 : vector<256xf32> to vector<1x256xf32>
    %15 = math.sqrt %14 : vector<1x256xf32>
    %cst_7 = arith.constant 1.000000e-10 : f32
    %16 = vector.broadcast %cst_7 : f32 to vector<1x256xf32>
    %17 = arith.maximumf %15, %16 : vector<1x256xf32>
    %18 = vector.broadcast %17 : vector<1x256xf32> to vector<8x256xf32>
    %19 = arith.divf %11, %18 : vector<8x256xf32>
    %c0_8 = arith.constant 0 : index
    %c0_9 = arith.constant 0 : index
    %c0_10 = arith.constant 0 : index
    %20 = vector.load %arg4[%c0_8, %c0_9, %c0_10] : memref<1x8x256xf32, #tpu.memory_space<vmem>>, vector<1x8x256xf32>
    %21 = vector.shape_cast %20 : vector<1x8x256xf32> to vector<8x256xf32>
    %22 = arith.mulf %21, %21 : vector<8x256xf32>
    %cst_11 = arith.constant dense<0.000000e+00> : vector<256xf32>
    %23 = vector.multi_reduction <add>, %22, %cst_11 [0] : vector<8x256xf32> to vector<256xf32>
    %24 = vector.shape_cast %23 : vector<256xf32> to vector<1x256xf32>
    %25 = math.sqrt %24 : vector<1x256xf32>
    %cst_12 = arith.constant 1.000000e-10 : f32
    %26 = vector.broadcast %cst_12 : f32 to vector<1x256xf32>
    %27 = arith.maximumf %25, %26 : vector<1x256xf32>
    %28 = vector.broadcast %27 : vector<1x256xf32> to vector<8x256xf32>
    %29 = arith.divf %21, %28 : vector<8x256xf32>
    %c0_13 = arith.constant 0 : index
    %c0_14 = arith.constant 0 : index
    %c0_15 = arith.constant 0 : index
    %30 = vector.load %arg5[%c0_13, %c0_14, %c0_15] : memref<1x8x256xf32, #tpu.memory_space<vmem>>, vector<1x8x256xf32>
    %31 = vector.shape_cast %30 : vector<1x8x256xf32> to vector<8x256xf32>
    %32 = arith.mulf %31, %31 : vector<8x256xf32>
    %cst_16 = arith.constant dense<0.000000e+00> : vector<256xf32>
    %33 = vector.multi_reduction <add>, %32, %cst_16 [0] : vector<8x256xf32> to vector<256xf32>
    %34 = vector.shape_cast %33 : vector<256xf32> to vector<1x256xf32>
    %35 = math.sqrt %34 : vector<1x256xf32>
    %cst_17 = arith.constant 1.000000e-10 : f32
    %36 = vector.broadcast %cst_17 : f32 to vector<1x256xf32>
    %37 = arith.maximumf %35, %36 : vector<1x256xf32>
    %38 = vector.broadcast %37 : vector<1x256xf32> to vector<8x256xf32>
    %39 = arith.divf %31, %38 : vector<8x256xf32>
    %cst_18 = arith.constant dense<0.000000e+00> : vector<8xf32>
    %40 = vector.multi_reduction <add>, %9, %cst_18 [1] : vector<8x256xf32> to vector<8xf32>
    %41 = vector.shape_cast %40 : vector<8xf32> to vector<8x1xf32>
    %cst_19 = arith.constant dense<0.000000e+00> : vector<8xf32>
    %42 = vector.multi_reduction <add>, %29, %cst_19 [1] : vector<8x256xf32> to vector<8xf32>
    %43 = vector.shape_cast %42 : vector<8xf32> to vector<8x1xf32>
    %cst_20 = arith.constant dense<0.000000e+00> : vector<8xf32>
    %44 = vector.multi_reduction <add>, %19, %cst_20 [1] : vector<8x256xf32> to vector<8xf32>
    %45 = vector.shape_cast %44 : vector<8xf32> to vector<8x1xf32>
    %cst_21 = arith.constant dense<0.000000e+00> : vector<8xf32>
    %46 = vector.multi_reduction <add>, %39, %cst_21 [1] : vector<8x256xf32> to vector<8xf32>
    %47 = vector.shape_cast %46 : vector<8xf32> to vector<8x1xf32>
    %cst_22 = arith.constant dense<0.000000e+00> : vector<8x8xf32>
    %48 = tpu.matmul %9, %19, %cst_22 {dimension_numbers = #tpu.dot_dimension_numbers<[1], [1], [0], [0], [0, 0, 1, 0], [], []>} : vector<8x256xf32>, vector<8x256xf32>, vector<8x8xf32> -> vector<8x8xf32>
    %cst_23 = arith.constant dense<0.000000e+00> : vector<8x8xf32>
    %49 = tpu.matmul %29, %39, %cst_23 {dimension_numbers = #tpu.dot_dimension_numbers<[1], [1], [0], [0], [0, 0, 1, 0], [], []>} : vector<8x256xf32>, vector<8x256xf32>, vector<8x8xf32> -> vector<8x8xf32>
    %50 = arith.mulf %41, %41 : vector<8x1xf32>
    %51 = vector.shape_cast %50 : vector<8x1xf32> to vector<1x8x1xf32>
    %cst_24 = arith.constant dense<0.000000e+00> : vector<1xf32>
    %52 = vector.multi_reduction <add>, %51, %cst_24 [1, 2] : vector<1x8x1xf32> to vector<1xf32>
    %53 = vector.shape_cast %52 : vector<1xf32> to vector<1x1x1xf32>
    %54 = vector.extract %53[0, 0, 0] : f32 from vector<1x1x1xf32>
    %55 = arith.mulf %41, %43 : vector<8x1xf32>
    %56 = vector.shape_cast %55 : vector<8x1xf32> to vector<1x8x1xf32>
    %cst_25 = arith.constant dense<0.000000e+00> : vector<1xf32>
    %57 = vector.multi_reduction <add>, %56, %cst_25 [1, 2] : vector<1x8x1xf32> to vector<1xf32>
    %58 = vector.shape_cast %57 : vector<1xf32> to vector<1x1x1xf32>
    %59 = vector.extract %58[0, 0, 0] : f32 from vector<1x1x1xf32>
    %60 = arith.mulf %45, %45 : vector<8x1xf32>
    %61 = vector.shape_cast %60 : vector<8x1xf32> to vector<1x8x1xf32>
    %cst_26 = arith.constant dense<0.000000e+00> : vector<1xf32>
    %62 = vector.multi_reduction <add>, %61, %cst_26 [1, 2] : vector<1x8x1xf32> to vector<1xf32>
    %63 = vector.shape_cast %62 : vector<1xf32> to vector<1x1x1xf32>
    %64 = vector.extract %63[0, 0, 0] : f32 from vector<1x1x1xf32>
    %cst_27 = arith.constant 6.553600e+04 : f32
    %65 = arith.subf %cst_27, %64 : f32
    %66 = arith.mulf %45, %47 : vector<8x1xf32>
    %67 = vector.shape_cast %66 : vector<8x1xf32> to vector<1x8x1xf32>
    %cst_28 = arith.constant dense<0.000000e+00> : vector<1xf32>
    %68 = vector.multi_reduction <add>, %67, %cst_28 [1, 2] : vector<1x8x1xf32> to vector<1xf32>
    %69 = vector.shape_cast %68 : vector<1xf32> to vector<1x1x1xf32>
    %70 = vector.extract %69[0, 0, 0] : f32 from vector<1x1x1xf32>
    %cst_29 = arith.constant 6.553600e+04 : f32
    %71 = arith.subf %cst_29, %70 : f32
    %72 = arith.mulf %48, %48 : vector<8x8xf32>
    %73 = vector.shape_cast %72 : vector<8x8xf32> to vector<1x8x8xf32>
    %cst_30 = arith.constant dense<0.000000e+00> : vector<1xf32>
    %74 = vector.multi_reduction <add>, %73, %cst_30 [1, 2] : vector<1x8x8xf32> to vector<1xf32>
    %75 = vector.shape_cast %74 : vector<1xf32> to vector<1x1x1xf32>
    %76 = vector.extract %75[0, 0, 0] : f32 from vector<1x1x1xf32>
    %77 = arith.mulf %48, %49 : vector<8x8xf32>
    %78 = vector.shape_cast %77 : vector<8x8xf32> to vector<1x8x8xf32>
    %cst_31 = arith.constant dense<0.000000e+00> : vector<1xf32>
    %79 = vector.multi_reduction <add>, %78, %cst_31 [1, 2] : vector<1x8x8xf32> to vector<1xf32>
    %80 = vector.shape_cast %79 : vector<1xf32> to vector<1x1x1xf32>
    %81 = vector.extract %80[0, 0, 0] : f32 from vector<1x1x1xf32>
    %82 = vector.broadcast %41 : vector<8x1xf32> to vector<8x256xf32>
    %83 = arith.mulf %9, %82 : vector<8x256xf32>
    %cst_32 = arith.constant dense<0.000000e+00> : vector<256xf32>
    %84 = vector.multi_reduction <add>, %83, %cst_32 [0] : vector<8x256xf32> to vector<256xf32>
    %85 = vector.shape_cast %84 : vector<256xf32> to vector<1x256xf32>
    %86 = vector.broadcast %45 : vector<8x1xf32> to vector<8x256xf32>
    %87 = arith.mulf %19, %86 : vector<8x256xf32>
    %cst_33 = arith.constant dense<0.000000e+00> : vector<256xf32>
    %88 = vector.multi_reduction <add>, %87, %cst_33 [0] : vector<8x256xf32> to vector<256xf32>
    %89 = vector.shape_cast %88 : vector<256xf32> to vector<1x256xf32>
    %90 = vector.broadcast %43 : vector<8x1xf32> to vector<8x256xf32>
    %91 = arith.mulf %9, %90 : vector<8x256xf32>
    %cst_34 = arith.constant dense<0.000000e+00> : vector<256xf32>
    %92 = vector.multi_reduction <add>, %91, %cst_34 [0] : vector<8x256xf32> to vector<256xf32>
    %93 = vector.shape_cast %92 : vector<256xf32> to vector<1x256xf32>
    %94 = vector.broadcast %47 : vector<8x1xf32> to vector<8x256xf32>
    %95 = arith.mulf %19, %94 : vector<8x256xf32>
    %cst_35 = arith.constant dense<0.000000e+00> : vector<256xf32>
    %96 = vector.multi_reduction <add>, %95, %cst_35 [0] : vector<8x256xf32> to vector<256xf32>
    %97 = vector.shape_cast %96 : vector<256xf32> to vector<1x256xf32>
    %98 = arith.mulf %85, %89 : vector<1x256xf32>
    %99 = vector.shape_cast %98 : vector<1x256xf32> to vector<1x1x256xf32>
    %cst_36 = arith.constant dense<0.000000e+00> : vector<1xf32>
    %100 = vector.multi_reduction <add>, %99, %cst_36 [1, 2] : vector<1x1x256xf32> to vector<1xf32>
    %101 = vector.shape_cast %100 : vector<1xf32> to vector<1x1x1xf32>
    %102 = vector.extract %101[0, 0, 0] : f32 from vector<1x1x1xf32>
    %cst_37 = arith.constant 3.906250e-03 : f32
    %103 = arith.mulf %102, %cst_37 : f32
    %104 = arith.subf %103, %76 : f32
    %105 = arith.mulf %93, %97 : vector<1x256xf32>
    %106 = vector.shape_cast %105 : vector<1x256xf32> to vector<1x1x256xf32>
    %cst_38 = arith.constant dense<0.000000e+00> : vector<1xf32>
    %107 = vector.multi_reduction <add>, %106, %cst_38 [1, 2] : vector<1x1x256xf32> to vector<1xf32>
    %108 = vector.shape_cast %107 : vector<1xf32> to vector<1x1x1xf32>
    %109 = vector.extract %108[0, 0, 0] : f32 from vector<1x1x1xf32>
    %cst_39 = arith.constant 3.906250e-03 : f32
    %110 = arith.mulf %109, %cst_39 : f32
    %111 = arith.subf %110, %81 : f32
    %112 = arith.index_cast %arg0 : i32 to index
    %c0_40 = arith.constant 0 : index
    %113 = memref.load %arg6[%112, %c0_40] : memref<2x6xf32, #tpu.memory_space<smem>>
    memref.store %54, %arg6[%112, %c0_40] : memref<2x6xf32, #tpu.memory_space<smem>>
    %114 = arith.index_cast %arg0 : i32 to index
    %c1 = arith.constant 1 : index
    %115 = memref.load %arg6[%114, %c1] : memref<2x6xf32, #tpu.memory_space<smem>>
    memref.store %65, %arg6[%114, %c1] : memref<2x6xf32, #tpu.memory_space<smem>>
    %116 = arith.index_cast %arg0 : i32 to index
    %c2 = arith.constant 2 : index
    %117 = memref.load %arg6[%116, %c2] : memref<2x6xf32, #tpu.memory_space<smem>>
    memref.store %104, %arg6[%116, %c2] : memref<2x6xf32, #tpu.memory_space<smem>>
    %118 = arith.index_cast %arg0 : i32 to index
    %c3 = arith.constant 3 : index
    %119 = memref.load %arg6[%118, %c3] : memref<2x6xf32, #tpu.memory_space<smem>>
    memref.store %59, %arg6[%118, %c3] : memref<2x6xf32, #tpu.memory_space<smem>>
    %120 = arith.index_cast %arg0 : i32 to index
    %c4 = arith.constant 4 : index
    %121 = memref.load %arg6[%120, %c4] : memref<2x6xf32, #tpu.memory_space<smem>>
    memref.store %71, %arg6[%120, %c4] : memref<2x6xf32, #tpu.memory_space<smem>>
    %122 = arith.index_cast %arg0 : i32 to index
    %c5 = arith.constant 5 : index
    %123 = memref.load %arg6[%122, %c5] : memref<2x6xf32, #tpu.memory_space<smem>>
    memref.store %111, %arg6[%122, %c5] : memref<2x6xf32, #tpu.memory_space<smem>>
    return
  }
  func.func @transform_0(%arg0: i32, %arg1: memref<2xi32, #tpu.memory_space<smem>>) -> (i32, i32, i32) {
    %c0_i32 = arith.constant 0 : i32
    %c0_i32_0 = arith.constant 0 : i32
    %c0_i32_1 = arith.constant 0 : i32
    return %arg0, %c0_i32, %c0_i32_0 : i32, i32, i32
  }
  func.func @transform_1(%arg0: i32, %arg1: memref<2xi32, #tpu.memory_space<smem>>) -> (i32, i32, i32) {
    %c0_i32 = arith.constant 0 : i32
    %c0_i32_0 = arith.constant 0 : i32
    %c0_i32_1 = arith.constant 0 : i32
    return %arg0, %c0_i32, %c0_i32_0 : i32, i32, i32
  }
  func.func @transform_2(%arg0: i32, %arg1: memref<2xi32, #tpu.memory_space<smem>>) -> (i32, i32, i32) {
    %0 = arith.index_cast %arg0 : i32 to index
    %1 = memref.load %arg1[%0] : memref<2xi32, #tpu.memory_space<smem>>
    %c0_i32 = arith.constant 0 : i32
    %c0_i32_0 = arith.constant 0 : i32
    %c0_i32_1 = arith.constant 0 : i32
    return %1, %c0_i32, %c0_i32_0 : i32, i32, i32
  }
  func.func @transform_3(%arg0: i32, %arg1: memref<2xi32, #tpu.memory_space<smem>>) -> (i32, i32, i32) {
    %0 = arith.index_cast %arg0 : i32 to index
    %1 = memref.load %arg1[%0] : memref<2xi32, #tpu.memory_space<smem>>
    %c0_i32 = arith.constant 0 : i32
    %c0_i32_0 = arith.constant 0 : i32
    %c0_i32_1 = arith.constant 0 : i32
    return %1, %c0_i32, %c0_i32_0 : i32, i32, i32
  }
  func.func @transform_4(%arg0: i32, %arg1: memref<2xi32, #tpu.memory_space<smem>>) -> (i32, i32) {
    %c0_i32 = arith.constant 0 : i32
    %c0_i32_0 = arith.constant 0 : i32
    %c0_i32_1 = arith.constant 0 : i32
    return %c0_i32, %c0_i32_0 : i32, i32
  }
}

</mosaic_0001>

<bundles_post_ra>
// kernel: tpu_custom_call.1
= control target key start
LH: loop header
LB: loop body
LE: loop exit
PB: predicated region body
PF: predicated region fallthrough
CT: control target
= control target key end

     0   :  { %s1948_s0 = inlined_call_operand.hbm [shape: s32[2], index: 0, kind: input, shape index: {}]   ;;  %s1949_s1 = inlined_call_operand.hbm [shape: f32[2,8,256], index: 1, kind: input, shape index: {}]   ;;  %s1950_s2 = inlined_call_operand.hbm [shape: f32[2,8,256], index: 2, kind: input, shape index: {}]   ;;  %s1951_s3 = inlined_call_operand.hbm [shape: f32[2,8,256], index: 3, kind: input, shape index: {}]   ;;  %s1952_s4 = inlined_call_operand.hbm [shape: f32[2,8,256], index: 4, kind: input, shape index: {}]   ;;  %s1953_s5 = inlined_call_operand.hbm [shape: f32[2,6], index: 5, kind: output, shape index: {}]  }
   0x1   :  { %1962 = sst [smem:[#allocation24_spill]] %s1950_s2  ;;  %s1138_s20 = scalar_lea.hbm %s1948_s0, 16 }
   0x2   :  { %1963 = sst [smem:[#allocation25_spill]] %s1953_s5  ;;  %p1139_p0 = scmp.ne.s32.totalorder %s1948_s0, %s1138_s20 }
   0x3   :  { %p1142_p1 = scmp.lt.u32.totalorder %s1138_s20, %s1948_s0 }
   0x5   :  { %p1144_p2 = pnand %p1142_p1, %p1139_p0 }
   0x7   :  { %1147 = shalt.err (!%p1144_p2)  }
   0x8   :  { %s1382_s25 = smov [#allocation3]  }
   0x9   :  { %11 = dma.hbm_to_smem %s1948_s0, 16, %s1382_s25, [#allocation2] }
   0xa   :  { %1320 = dma.done.wait [#allocation2], 16 }
   0xb   :  { %1321 = vsyncadd [#allocation2], 4294967280 }
   0xc   :  { %13 = sfence }
   0xd   :  { %14 = vsyncpa [#allocation5], 0 }
   0xe   :  { %16 = vsyncpa [#allocation5 + $0x1], 0 }
   0xf   :  { %17 = vsyncpa [#allocation8], 0 }
  0x10   :  { %19 = vsyncpa [#allocation8 + $0x1], 0 }
  0x11   :  { %20 = vsyncpa [#allocation11], 0 }
  0x12   :  { %22 = vsyncpa [#allocation11 + $0x1], 0 }
  0x13   :  { %23 = vsyncpa [#allocation6], 0  ;;  %s1430_s28 = smov 0   ;;  %s1432_s29 = smov 0  }
  0x14   :  { %s1434_s30 = smov 0   ;;  %s1436_s6 = smov 0  }
  0x15   :  { %s1438_s7 = smov 0   ;;  %s1440_s0 = smov 0  }
  0x16   :  { %s1442_s8 = smov 0   ;;  %s1444_s9 = smov 0  }
  0x17   :  { %s1446_s10 = smov 0   ;;  %s1448_s11 = smov 0  }
  0x18 LB: > { %s1479_s12 = sadd.s32 4294967295, %s1380_s11   ;;  %s1482_s13 = sadd.s32 1, %s1380_s11   ;;  %s1380_s11 = sphi %s1448_s11, %s2004_s11   ;;  %s1376_s10 = sphi %s1446_s10, %s2003_s10   ;;  %s1372_s9 = sphi %s1444_s9, %s2002_s9   ;;  %s1368_s8 = sphi %s1442_s8, %s2001_s8   ;;  %s1364_s0 = sphi %s1440_s0, %s2000_s0   ;;  %s1360_s7 = sphi %s1438_s7, %s1999_s7   ;;  %s1356_s6 = sphi %s1436_s6, %s1998_s6   ;;  %s1352_s30 = sphi %s1434_s30, %s1997_s30   ;;  %s1348_s29 = sphi %s1432_s29, %s1996_s29   ;;  %s1344_s28 = sphi %s1430_s28, %s1995_s28  }
  0x19   : > { %s33_s14 = ssub.s32 %s1380_s11, %s1482_s13  ;;  %s36_s15 = sadd.s32 1, %s1376_s10 }
  0x1a   : > { %p34_p3 = scmp.eq.s32.totalorder %s33_s14, 0  ;;  %p43_p4 = scmp.ne.s32.totalorder %s1376_s10, %s1372_s9 }
  0x1b   : > { %p1958_p5 = scmp.eq.s32.totalorder %s1380_s11, 0  ;;  %p49_p6 = scmp.ne.s32.totalorder %s1372_s9, %s1368_s8 }
  0x1c   : > { %s1492_s16 = scalar_select %p34_p3, %s1376_s10, %s36_s15  }
  0x1d   : > { %p45_p7 = por %p1958_p5, %p43_p4  ;;  %p1957_p8 = scmp.eq.s32.totalorder %s1479_s12, 0 }
  0x1e   : > { %1964 = sst [smem:[#allocation23_spill]] %s1492_s16  ;;  %p1956_p10 = scmp.lt.s32.totalorder %s1380_s11, 2 }
  0x1f   : > { %s1498_s17 = sld [smem:[#allocation3 + %s1482_s13]]  ;;  %p1502_p9 = por %p1957_p8, %p49_p6 }
  0x20   : > { %s1954_s19 = sand.u32 1, %s1376_s10   ;;  %s1955_s20 = sshll.u32 %s1380_s11, 8 }
  0x21   : > { %s1965_s18 = scalar_select %p1502_p9, 1, 0 }
  0x22   : > { %s1511_s21 = sshll.u32 %s1954_s19, 4  ;;  %p1515_p11 = pnand %p1956_p10, %p45_p7 }
  0x23   : > { %s195_s23 = sand.u32 1, %s1380_s11   ;;  %s1967_s2 = sld [smem:[#allocation24_spill]] }
  0x24   : > { %s199_s27 = scalar_lea.vmem [#allocation7], %s1511_s21  ;;  %s1531_s14 = scalar_lea.sflag [#allocation8], %s195_s23 }
  0x25   : > { %s207_s8 = sshll.u32 %s199_s27, 4  ;;  %p1150_p0 = pneg %p1515_p11  ;;  %s1528_s8 = int_to_ptr.vmem [resolvable:$true] %s207_s8 }
  0x29   : > { %s1525_s26 = scalar_lea.hbm %s1967_s2, %s1955_s20  ;;  %s1153_s19 = scalar_lea.hbm %s1967_s2, 512 }
  0x2a   : > { %s1148_s15 = scalar_lea.hbm %s1525_s26, 256  ;;  %p1154_p3 = scmp.lt.u32.totalorder %s1525_s26, %s1967_s2 }
  0x2b   : > { %p1149_p13 = scmp.ne.s32.totalorder %s1525_s26, %s1148_s15  ;;  %p1155_p4 = scmp.lt.u32.totalorder %s1153_s19, %s1148_s15 }
  0x2c   : > { %p1157_p7 = scmp.lt.u32.totalorder %s1148_s15, %s1525_s26 }
  0x2d   : > { %p1151_p1 = pnand %p1150_p0, %p1149_p13  ;;  %p1156_p6 = por %p1155_p4, %p1154_p3 }
  0x2f   : > { %p1152_p2 = pneg %p1151_p1  ;;  %p1158_p10 = por %p1157_p7, %p1156_p6 }
  0x31   : > { %p1159_p8 = pnand %p1158_p10, %p1152_p2 }
  0x33   : > { %1162 = shalt.err (!%p1159_p8)
}
  0x34   : > { %s1163_s23 = scalar_lea.vmem %s1528_s8, 256  ;;  %s1383_s27 = smov [#allocation7]  }
  0x35   : > { %p1164_p13 = scmp.ne.s32.totalorder %s1528_s8, %s1163_s23  ;;  %s1168_s24 = sshll.u32 %s1383_s27, 4  ;;  %s1169_s24 = int_to_ptr.vmem [resolvable:$false] %s1168_s24 }
  0x36   : > { %s1170_s16 = scalar_lea.vmem %s1169_s24, 512  ;;  %p1171_p12 = scmp.lt.s32.totalorder %s1528_s8, %s1169_s24 }
  0x37   : > { %p1166_p1 = pnand %p1164_p13, %p1150_p0  ;;  %p1172_p3 = scmp.lt.s32.totalorder %s1170_s16, %s1163_s23 }
  0x39   : > { %p1167_p5 = pneg %p1166_p1  ;;  %p1173_p4 = por %p1172_p3, %p1171_p12 }
  0x3b   : > { %p1174_p6 = pnand %p1173_p4, %p1167_p5 }
  0x3d   : > { %1177 = shalt.err (!%p1174_p6)
}
  0x3e   : > { %1010 = dma.hbm_to_vmem [thread:$0]  (!%p1515_p11), %s1525_s26, 256, %s1528_s8, %s1531_s14  }
  0x3f   : > { %p252_p8 = scmp.lt.s32.totalorder %s1380_s11, 3  ;;  %s1968_s19 = sshll.u32 %s1380_s11, 8 }
  0x40   : > { %s1565_s25 = scalar_lea.hbm %s1949_s1, %s1968_s19  ;;  %p1969_p5 = scmp.ge.s32.totalorder %s1380_s11, 1 }
  0x41   : > { %s180_s27 = scalar_lea.vmem [#allocation4], %s1511_s21  ;;  %s1971_s26 = sand.u32 1, %s1376_s10  }
  0x42   : > { %p1569_p10 = pnand %p1969_p5, %p252_p8  ;;  %s188_s24 = sshll.u32 %s180_s27, 4  ;;  %s189_s24 = int_to_ptr.vmem [resolvable:$true] %s188_s24 }
  0x43   : > { %s177_s8 = scalar_lea.sflag [#allocation5], %s1971_s26  ;;  %s1178_s16 = scalar_lea.hbm %s1565_s25, 256 }
  0x44   : > { %s1970_s23 = scalar_select %p1569_p10, 1, 0 }
  0x45   : > { %p1179_p12 = scmp.ne.s32.totalorder %s1565_s25, %s1178_s16  ;;  %s1183_s15 = scalar_lea.hbm %s1949_s1, 512 }
  0x46   : > { %p1184_p13 = scmp.lt.u32.totalorder %s1565_s25, %s1949_s1  ;;  %p1185_p1 = scmp.lt.u32.totalorder %s1183_s15, %s1178_s16 }
  0x47   : > { %p1181_p2 = pnand %p1179_p12, %p1150_p0  ;;  %p1187_p4 = scmp.lt.u32.totalorder %s1178_s16, %s1565_s25 }
  0x48   : > { %p1186_p3 = por %p1185_p1, %p1184_p13 }
  0x49   : > { %p1182_p7 = pneg %p1181_p2 }
  0x4a   : > { %p1188_p6 = por %p1187_p4, %p1186_p3 }
  0x4c   : > { %p1189_p8 = pnand %p1188_p6, %p1182_p7 }
  0x4e   : > { %1192 = shalt.err (!%p1189_p8)
}
  0x4f   : > { %s1193_s21 = scalar_lea.vmem %s189_s24, 256  ;;  %s1384_s27 = smov [#allocation4]  }
  0x50   : > { %p1194_p5 = scmp.ne.s32.totalorder %s189_s24, %s1193_s21  ;;  %s1198_s26 = sshll.u32 %s1384_s27, 4  ;;  %s1199_s26 = int_to_ptr.vmem [resolvable:$false] %s1198_s26 }
  0x51   : > { %s1200_s19 = scalar_lea.vmem %s1199_s26, 512  ;;  %p1201_p9 = scmp.lt.s32.totalorder %s189_s24, %s1199_s26 }
  0x52   : > { %p1196_p12 = pnand %p1194_p5, %p1150_p0  ;;  %p1202_p10 = scmp.lt.s32.totalorder %s1200_s19, %s1193_s21 }
  0x54   : > { %p1197_p2 = pneg %p1196_p12  ;;  %p1203_p1 = por %p1202_p10, %p1201_p9 }
  0x56   : > { %p1204_p13 = pnand %p1203_p1, %p1197_p2 }
  0x58   : > { %1207 = shalt.err (!%p1204_p13)
}
  0x59   : > { %1007 = dma.hbm_to_vmem [thread:$0]  (!%p1515_p11), %s1565_s25, 256, %s189_s24, %s177_s8  }
  0x5a   : > { %s85_s2 = sld [smem:[#allocation3 + %s1380_s11]]  ;;  %p97_p9 = scmp.ne.s32.totalorder %s1364_s0, %s1360_s7 }
  0x5b   : > { %p103_p0 = scmp.ne.s32.totalorder %s1360_s7, %s1356_s6  ;;  %s216_s5 = sand.u32 1, %s1364_s0  }
  0x5c   : > { %p1972_p10 = scmp.eq.s32.totalorder %s1380_s11, 0  ;;  %s947_s16 = sshll.u32 %s216_s5, 4 }
  0x5d   : > { %p1974_p3 = scmp.eq.s32.totalorder %s1479_s12, 0  ;;  %s90_s8 = sadd.s32 1, %s1364_s0 }
  0x5e   : > { %p1603_p7 = por %p97_p9, %p1972_p10  ;;  %s218_s20 = scalar_lea.vmem [#allocation9], %s947_s16 }
  0x5f   : > { %p1609_p11 = por %p103_p0, %p1974_p3  ;;  %s227_s15 = sshll.u32 %s218_s20, 4  ;;  %s1638_s15 = int_to_ptr.vmem [resolvable:$true] %s227_s15 }
  0x60   : > { %s990_s6 = scalar_select %p1603_p7, [#allocation3], [#allocation13] }
  0x61   : > { %s1975_s25 = scalar_select %p1609_p11, 1, 0 }
  0x62   : > { %s87_s24 = ssub.s32 %s85_s2, %s1498_s17  ;;  %p1976_p6 = scmp.lt.s32.totalorder %s1380_s11, 2 }
  0x63   : > { %p88_p4 = scmp.eq.s32.totalorder %s87_s24, 0  ;;  %s1636_s19 = sld [smem:[#allocation3 + %s1380_s11]] }
  0x64   : > { %s991_s21 = scalar_select %p1603_p7, %s1380_s11, 0 }
  0x65   : > { %s1621_s27 = scalar_select %p88_p4, %s1364_s0, %s90_s8  }
  0x66   : > { %s2006_s6 = smov (!%p1976_p6, %s990_s6), [#allocation15]  ;;  %p1977_p8 = pmov %p1976_p6 }
  0x67   : > { %p1978_p5 = pmov %p1976_p6  ;;  %s1641_s2 = sld [smem:[#allocation3 + %s1482_s13]] }
  0x68   : > { %s2008_s21 = smov (!%p1977_p8, %s991_s21), 0  ;;  %p125_p2 = scmp.ne.s32.totalorder %s1352_s30, %s1348_s29 }
  0x69   : > { %p1631_p12 = pnand %p1978_p5, %p1603_p7  ;;  %s219_s17 = sld [smem:[%s2006_s6 + %s2008_s21]] }
  0x6a   : > { %p1980_p13 = pmov %p1972_p10 }
  0x6b   : > { %p1210_p10 = pneg %p1631_p12 }
  0x6c   : > { %p1655_p9 = por %p125_p2, %p1980_p13 }
  0x6f   : > { %s970_s5 = sshll.u32 %s219_s17, 8 }
  0x70   : > { %s1651_s8 = scalar_lea.hbm %s1951_s3, %s970_s5  ;;  %s1213_s5 = scalar_lea.hbm %s1951_s3, 512 }
  0x71   : > { %s1208_s20 = scalar_lea.hbm %s1651_s8, 256  ;;  %p1214_p4 = scmp.lt.u32.totalorder %s1651_s8, %s1951_s3 }
  0x72   : > { %p1209_p0 = scmp.ne.s32.totalorder %s1651_s8, %s1208_s20  ;;  %p1215_p6 = scmp.lt.u32.totalorder %s1213_s5, %s1208_s20 }
  0x73   : > { %p1217_p5 = scmp.lt.u32.totalorder %s1208_s20, %s1651_s8 }
  0x74   : > { %p1211_p7 = pnand %p1210_p10, %p1209_p0  ;;  %p1216_p8 = por %p1215_p6, %p1214_p4 }
  0x76   : > { %p1212_p3 = pneg %p1211_p7  ;;  %p1218_p2 = por %p1217_p5, %p1216_p8 }
  0x78   : > { %p1219_p13 = pnand %p1218_p2, %p1212_p3 }
  0x7a   : > { %1222 = shalt.err (!%p1219_p13)
}
  0x7b   : > { %s1223_s16 = scalar_lea.vmem %s1638_s15, 256  ;;  %s1385_s21 = smov [#allocation9]  }
  0x7c   : > { %p1224_p0 = scmp.ne.s32.totalorder %s1638_s15, %s1223_s16  ;;  %s1228_s17 = sshll.u32 %s1385_s21, 4  ;;  %s1229_s17 = int_to_ptr.vmem [resolvable:$false] %s1228_s17 }
  0x7d   : > { %s1230_s24 = scalar_lea.vmem %s1229_s17, 512  ;;  %p1231_p11 = scmp.lt.s32.totalorder %s1638_s15, %s1229_s17 }
  0x7e   : > { %p1226_p7 = pnand %p1224_p0, %p1210_p10  ;;  %p1232_p4 = scmp.lt.s32.totalorder %s1230_s24, %s1223_s16 }
  0x80   : > { %p1227_p1 = pneg %p1226_p7  ;;  %p1233_p6 = por %p1232_p4, %p1231_p11 }
  0x82   : > { %p1234_p8 = pnand %p1233_p6, %p1227_p1 }
  0x84   : > { %1237 = shalt.err (!%p1234_p8)
}
  0x85   : > { %1015 = dma.hbm_to_vmem [thread:$0]  (!%p1631_p12), %s1651_s8, 256, %s1638_s15, %s1531_s14  }
  0x86   : > { %p1982_p11 = scmp.eq.s32.totalorder %s1479_s12, 0  ;;  %p1983_p1 = scmp.ne.s32.totalorder %s1348_s29, %s1344_s28 }
  0x87   : > { %s115_s16 = ssub.s32 %s1636_s19, %s1641_s2  ;;  %s118_s20 = sadd.s32 1, %s1352_s30 }
  0x88   : > { %p1690_p10 = por %p1983_p1, %p1982_p11  ;;  %p116_p3 = scmp.eq.s32.totalorder %s115_s16, 0 }
  0x89   : > { %s1985_s5 = sand.u32 1, %s1352_s30   ;;  %p1986_p5 = scmp.lt.s32.totalorder %s1380_s11, 2 }
  0x8a   : > { %s950_s22 = sshll.u32 %s1985_s5, 4 }
  0x8b   : > { %s993_s21 = scalar_select %p1655_p9, [#allocation3], [#allocation14] }
  0x8c   : > { %s1702_s17 = scalar_select %p116_p3, %s1352_s30, %s118_s20  }
  0x8d   : > { %s994_s24 = scalar_select %p1655_p9, %s1380_s11, 0 }
  0x8e   : > { %s2010_s21 = smov (!%p1986_p5, %s993_s21), [#allocation16]  ;;  %p1987_p12 = pmov %p1986_p5 }
  0x8f   : > { %p1988_p2 = pmov %p1986_p5  ;;  %s238_s15 = scalar_lea.vmem [#allocation10], %s950_s22 }
  0x90   : > { %s2012_s24 = smov (!%p1987_p12, %s994_s24), 0  ;;  %s247_s19 = sshll.u32 %s238_s15, 4  ;;  %s1719_s19 = int_to_ptr.vmem [resolvable:$true] %s247_s19 }
  0x91   : > { %p1715_p13 = pnand %p1988_p2, %p1655_p9  ;;  %s239_s14 = sld [smem:[%s2010_s21 + %s2012_s24]] }
  0x92   : > { %s235_s11 = scalar_lea.sflag [#allocation11], %s1985_s5  ;;  %s1243_s24 = scalar_lea.hbm %s1952_s4, 512 }
  0x93   : > { %p1240_p0 = pneg %p1715_p13 }
  0x97   : > { %s971_s2 = sshll.u32 %s239_s14, 8 }
  0x98   : > { %s1724_s20 = scalar_lea.hbm %s1952_s4, %s971_s2 }
  0x99   : > { %s1238_s6 = scalar_lea.hbm %s1724_s20, 256  ;;  %p1244_p6 = scmp.lt.u32.totalorder %s1724_s20, %s1952_s4 }
  0x9a   : > { %p1239_p9 = scmp.ne.s32.totalorder %s1724_s20, %s1238_s6  ;;  %p1245_p8 = scmp.lt.u32.totalorder %s1243_s24, %s1238_s6 }
  0x9b   : > { %p1247_p1 = scmp.lt.u32.totalorder %s1238_s6, %s1724_s20 }
  0x9c   : > { %p1241_p7 = pnand %p1240_p0, %p1239_p9  ;;  %p1246_p11 = por %p1245_p8, %p1244_p6 }
  0x9e   : > { %p1242_p4 = pneg %p1241_p7  ;;  %p1248_p3 = por %p1247_p1, %p1246_p11 }
  0xa0   : > { %p1249_p5 = pnand %p1248_p3, %p1242_p4 }
  0xa2   : > { %1252 = shalt.err (!%p1249_p5)
}
  0xa3   : > { %s1253_s2 = scalar_lea.vmem %s1719_s19, 256  ;;  %s1386_s8 = smov [#allocation10]  }
  0xa4   : > { %p1254_p12 = scmp.ne.s32.totalorder %s1719_s19, %s1253_s2  ;;  %s1258_s16 = sshll.u32 %s1386_s8, 4  ;;  %s1259_s16 = int_to_ptr.vmem [resolvable:$false] %s1258_s16 }
  0xa5   : > { %s1260_s5 = scalar_lea.vmem %s1259_s16, 512  ;;  %p1261_p7 = scmp.lt.s32.totalorder %s1719_s19, %s1259_s16 }
  0xa6   : > { %p1256_p2 = pnand %p1254_p12, %p1240_p0  ;;  %p1262_p6 = scmp.lt.s32.totalorder %s1260_s5, %s1253_s2 }
  0xa8   : > { %p1257_p9 = pneg %p1256_p2  ;;  %p1263_p8 = por %p1262_p6, %p1261_p7 }
  0xaa   : > { %p1264_p11 = pnand %p1263_p8, %p1257_p9 }
  0xac   : > { %1267 = shalt.err (!%p1264_p11)
}
  0xad   : > { %1020 = dma.hbm_to_vmem [thread:$0]  (!%p1715_p13), %s1724_s20, 256, %s1719_s19, %s235_s11  }
  0xae   : > { %p1990_p4 = scmp.ne.s32.totalorder %s1970_s23, 0 }
  0xaf   : > { %s258_s6 = sand.u32 (!%p1990_p4), 1, %s1372_s9   ;;  %p1991_p0 = scmp.ne.s32.totalorder (!%p1990_p4), %s1965_s18, 0 }
  0xb0   : > { %256 = sbr.rel (%p1990_p4) target bundleno = 683 (0x2ab), region = 36  ;;  %s1756_s22 = sshll.u32 (!%p1990_p4), %s258_s6, 4 }
  0xb1   : > { %s259_s21 = scalar_lea.sflag (!%p1990_p4), [#allocation5], %s258_s6  ;;  %s262_s24 = scalar_lea.vmem (!%p1990_p4), [#allocation4], %s1756_s22 }
  0xb7   : > { %1323 = dma.done.wait (%p1991_p0), %s259_s21, 256  }
  0xb8   : > { %1325 = vsyncadd (%p1991_p0), %s259_s21, 4294967040  ;;  %s267_s28 = sand.u32 1, %s1479_s12   ;;  %s271_s23 = scalar_lea.vmem [#allocation7], %s1756_s22 }
  0xb9   : > { %s268_s19 = scalar_lea.sflag [#allocation8], %s267_s28 }
  0xba   : > { %1327 = dma.done.wait (%p1991_p0), %s268_s19, 256  }
  0xbb   : > { %1329 = vsyncadd (%p1991_p0), %s268_s19, 4294967040  ;;  %s278_s20 = sand.u32 1, %s1360_s7   ;;  %p1992_p13 = scmp.ne.s32.totalorder %s1975_s25, 0 }
  0xbc   : > { %s956_s11 = sshll.u32 %s278_s20, 4 }
  0xbd   : > { %s280_s14 = scalar_lea.vmem [#allocation9], %s956_s11 }
  0xbe   : > { %1331 = dma.done.wait (%p1992_p13), %s268_s19, 256  }
  0xbf   : > { %1333 = vsyncadd (%p1992_p13), %s268_s19, 4294967040  ;;  %s285_s15 = sand.u32 1, %s1348_s29  }
  0xc0   : > { %s957_s2 = sshll.u32 %s285_s15, 4  ;;  %s286_s8 = scalar_lea.sflag [#allocation11], %s285_s15 }
  0xc1   : > { %s289_s16 = scalar_lea.vmem [#allocation10], %s957_s2 }
  0xc2   : > { %1335 = dma.done.wait (%p1690_p10), %s286_s8, 256  }
  0xc3   : > { %1337 = vsyncadd (%p1690_p10), %s286_s8, 4294967040  ;;  %v1779_v0 = vld [vmem:[%s271_s23 + $0x8] sm:$0xff]  ;;  %v1783_v2 = vld [vmem:[%s271_s23] sm:$0xff]  ;;  %s958_s18 = sshll.u32 %s1479_s12, 7  ;;  %p1022_p10 = scmp.eq.s32.totalorder %s1479_s12, 1 }
  0xc4   : > { %v1781_v1 = vld [vmem:[%s289_s16 + $0x8] sm:$0xff]  ;;  %v365_v3 = vmul.f32 %v1779_v0, %v1779_v0  ;;  %v364_v5 = vmul.f32 %v1783_v2, %v1783_v2  ;;  %v1791_v6 = vld [vmem:[%s289_s16] sm:$0xff]  ;;  %s1888_s26 = scalar_lea.smem [#allocation12], %s958_s18 }
  0xc5   : > { %v437_v4 = vmul.f32 %v1781_v1, %v1781_v1  ;;  %v1795_v7 = vld [vmem:[%s262_s24 + $0x8] sm:$0xff]  ;;  %v436_v9 = vmul.f32 %v1791_v6, %v1791_v6  ;;  %v1807_v12 = vld [vmem:[%s262_s24] sm:$0xff]  ;;  %s884_s5 = scalar_lea.smem %s1888_s26, 3 [#allocation12]  ;;  %s878_s22 = scalar_lea.smem %s1888_s26, 1 [#allocation12] }
  0xc6   : > { %v1797_v8 = vld [vmem:[%s280_s14 + $0x8] sm:$0xff]  ;;  %v329_v10 = vmul.f32 %v1795_v7, %v1795_v7  ;;  %v1809_v13 = vld [vmem:[%s280_s14] sm:$0xff]  ;;  %v372_v14 = vrot.slane %v365_v3, 4  ;;  %v366_v16 = vrot.slane %v364_v5, 4  ;;  %v328_v17 = vmul.f32 %v1807_v12, %v1807_v12  ;;  %s887_s28 = scalar_lea.smem %s1888_s26, 4 [#allocation12]  ;;  %s881_s15 = scalar_lea.smem %s1888_s26, 2 [#allocation12] }
  0xc7   : > { %v401_v11 = vmul.f32 %v1797_v8, %v1797_v8  ;;  %v444_v15 = vrot.slane %v437_v4, 4  ;;  %v438_v18 = vrot.slane %v436_v9, 4  ;;  %v400_v21 = vmul.f32 %v1809_v13, %v1809_v13  ;;  %s890_s18 = scalar_lea.smem %s1888_s26, 5 [#allocation12] }
  0xc8   : > { %v336_v19 = vrot.slane %v329_v10, 4  ;;  %v373_v22 = vadd.f32 %v372_v14, %v365_v3  ;;  %v367_v24 = vadd.f32 %v366_v16, %v364_v5  ;;  %v330_v25 = vrot.slane %v328_v17, 4 }
  0xc9   : > { %v408_v20 = vrot.slane %v401_v11, 4  ;;  %v445_v23 = vadd.f32 %v444_v15, %v437_v4  ;;  %v439_v26 = vadd.f32 %v438_v18, %v436_v9  ;;  %v402_v29 = vrot.slane %v400_v21, 4 }
  0xca   : > { %v337_v27 = vadd.f32 %v336_v19, %v329_v10  ;;  %v374_v30 = vrot.slane %v373_v22, 2  ;;  %v368_v32 = vrot.slane %v367_v24, 2  ;;  %v331_v33 = vadd.f32 %v330_v25, %v328_v17 }
  0xcb   : > { %v409_v28 = vadd.f32 %v408_v20, %v401_v11  ;;  %v446_v31 = vrot.slane %v445_v23, 2  ;;  %v440_v34 = vrot.slane %v439_v26, 2  ;;  %v403_v37 = vadd.f32 %v402_v29, %v400_v21 }
  0xcc   : > { %v338_v35 = vrot.slane %v337_v27, 2  ;;  %v375_v38 = vadd.f32 %v374_v30, %v373_v22  ;;  %v369_v40 = vadd.f32 %v368_v32, %v367_v24  ;;  %v332_v41 = vrot.slane %v331_v33, 2 }
  0xcd   : > { %v410_v36 = vrot.slane %v409_v28, 2  ;;  %v447_v39 = vadd.f32 %v446_v31, %v445_v23  ;;  %v441_v42 = vadd.f32 %v440_v34, %v439_v26  ;;  %v404_v45 = vrot.slane %v403_v37, 2 }
  0xce   : > { %v339_v43 = vadd.f32 %v338_v35, %v337_v27  ;;  %v376_v46 = vrot.slane %v375_v38, 1  ;;  %v370_v48 = vrot.slane %v369_v40, 1  ;;  %v333_v52 = vadd.f32 %v332_v41, %v331_v33 }
  0xcf   : > { %v411_v44 = vadd.f32 %v410_v36, %v409_v28  ;;  %v448_v47 = vrot.slane %v447_v39, 1  ;;  %v442_v49 = vrot.slane %v441_v42, 1  ;;  %v405_v56 = vadd.f32 %v404_v45, %v403_v37 }
  0xd0   : > { %v340_v50 = vrot.slane %v339_v43, 1  ;;  %v377_v53 = vadd.f32 %v376_v46, %v375_v38  ;;  %v371_v55 = vadd.f32 %v370_v48, %v369_v40  ;;  %v334_v60 = vrot.slane %v333_v52, 1 }
  0xd1   : > { %v412_v51 = vrot.slane %v411_v44, 1  ;;  %v449_v54 = vadd.f32 %v448_v47, %v447_v39  ;;  %v1815_v57 = vadd.f32 %v442_v49, %v441_v42  ;;  %v406_v61 = vrot.slane %v405_v56, 1 }
  0xd2   : > { %1106 = vrsqrt.f32 %v377_v53  ;;  %v1817_v58 = vadd.f32 %v340_v50, %v339_v43  ;;  %v1824_v62 = vadd.f32 %v334_v60, %v333_v52  ;;  %vm387_vm0 = vcmp.eq.f32.partialorder %v377_v53, inf }
  0xd3   : > { %1108 = vrsqrt.f32 %v449_v54  ;;  %v1819_v59 = vadd.f32 %v412_v51, %v411_v44  ;;  %v1826_v63 = vadd.f32 %v406_v61, %v405_v56  ;;  %vm389_vm1 = vcmp.eq.f32.partialorder %v377_v53, 0.0 }
  0xd4   : > { %1110 = vrsqrt.f32 %v371_v55  ;;  %v390_v3 = vand.u32 2147483648, %v377_v53  ;;  %vm459_vm2 = vcmp.eq.f32.partialorder %v449_v54, inf  ;;  %vm461_vm3 = vcmp.eq.f32.partialorder %v449_v54, 0.0 }
  0xd5   : > { %1112 = vrsqrt.f32 %v1815_v57  ;;  %v462_v4 = vand.u32 2147483648, %v449_v54  ;;  %vm380_vm4 = vcmp.eq.f32.partialorder %v371_v55, inf  ;;  %vm382_vm5 = vcmp.eq.f32.partialorder %v371_v55, 0.0 }
  0xd6   : > { %1114 = vrsqrt.f32 %v1817_v58  ;;  %v383_v5 = vand.u32 2147483648, %v371_v55  ;;  %vm452_vm6 = vcmp.eq.f32.partialorder %v1815_v57, inf  ;;  %vm454_vm7 = vcmp.eq.f32.partialorder %v1815_v57, 0.0 }
  0xd7   : > { %1116 = vrsqrt.f32 %v1819_v59  ;;  %v455_v10 = vand.u32 2147483648, %v1815_v57  ;;  %vm351_vm8 = vcmp.eq.f32.partialorder %v1817_v58, inf  ;;  %vm353_vm9 = vcmp.eq.f32.partialorder %v1817_v58, 0.0 }
  0xd8   : > { %1118 = vrsqrt.f32 %v1824_v62  ;;  %v354_v15 = vand.u32 2147483648, %v1817_v58  ;;  %vm423_vm10 = vcmp.eq.f32.partialorder %v1819_v59, inf  ;;  %vm425_vm11 = vcmp.eq.f32.partialorder %v1819_v59, 0.0 }
  0xd9   : > { %1120 = vrsqrt.f32 %v1826_v63  ;;  %v426_v18 = vand.u32 2147483648, %v1819_v59  ;;  %vm344_vm12 = vcmp.eq.f32.partialorder %v1824_v62, inf  ;;  %vm346_vm13 = vcmp.eq.f32.partialorder %v1824_v62, 0.0 }
  0xda   : > { %v347_v22 = vand.u32 2147483648, %v1824_v62  ;;  %vm416_vm14 = vcmp.eq.f32.partialorder %v1826_v63, inf  ;;  %v419_v27 = vand.u32 2147483648, %v1826_v63  ;;  %vm418_vm15 = vcmp.eq.f32.partialorder %v1826_v63, 0.0 }
  0xdc   : > { %v1107_v9 = vpop.eup %1106 }
  0xdd   : > { %v1109_v11 = vpop.eup %1108  ;;  %v386_v14 = vmul.f32 %v1107_v9, %v377_v53 }
  0xde   : > { %v1111_v16 = vpop.eup %1110  ;;  %v458_v17 = vmul.f32 %v1109_v11, %v449_v54 }
  0xdf   : > { %v1113_v19 = vpop.eup %1112  ;;  %v388_v20 = vsel %vm387_vm0, %v377_v53, %v386_v14  ;;  %v379_v21 = vmul.f32 %v1111_v16, %v371_v55  ;;  %vm623_vm0 = vcmask 7168  }
  0xe0   : > { %v1115_v23 = vpop.eup %1114  ;;  %v391_v24 = vsel %vm389_vm1, %v390_v3, %v388_v20  ;;  %v460_v25 = vsel %vm459_vm2, %v449_v54, %v458_v17  ;;  %v451_v26 = vmul.f32 %v1113_v19, %v1815_v57  ;;  %vm670_vm1 = vcmask 64512  }
  0xe1   : > { %v1117_v28 = vpop.eup %1116  ;;  %v393_v29 = vmax.f32 %v391_v24, 1e-10  ;;  %v463_v30 = vsel %vm461_vm3, %v462_v4, %v460_v25  ;;  %v381_v31 = vsel %vm380_vm4, %v371_v55, %v379_v21  ;;  %v350_v32 = vmul.f32 %v1115_v23, %v1817_v58 }
  0xe2   : > { %v465_v33 = vmax.f32 %v463_v30, 1e-10  ;;  %v384_v34 = vsel %vm382_vm5, %v383_v5, %v381_v31  ;;  %v453_v35 = vsel %vm452_vm6, %v1815_v57, %v451_v26  ;;  %v422_v36 = vmul.f32 %v1117_v28, %v1819_v59  ;;  %v1119_v40 = vpop.eup %1118 }
  0xe3   : > { %1122 = vrcp.f32 %v393_v29  ;;  %v392_v37 = vmax.f32 %v384_v34, 1e-10  ;;  %v456_v38 = vsel %vm454_vm7, %v455_v10, %v453_v35  ;;  %v352_v39 = vsel %vm351_vm8, %v1817_v58, %v350_v32  ;;  %v1121_v44 = vpop.eup %1120 }
  0xe4   : > { %1124 = vrcp.f32 %v465_v33  ;;  %v464_v41 = vmax.f32 %v456_v38, 1e-10  ;;  %v355_v42 = vsel %vm353_vm9, %v354_v15, %v352_v39  ;;  %v424_v43 = vsel %vm423_vm10, %v1819_v59, %v422_v36 }
  0xe5   : > { %1126 = vrcp.f32 %v392_v37  ;;  %v357_v45 = vmax.f32 %v355_v42, 1e-10  ;;  %v427_v46 = vsel %vm425_vm11, %v426_v18, %v424_v43  ;;  %v343_v47 = vmul.f32 %v1119_v40, %v1824_v62 }
  0xe6   : > { %1128 = vrcp.f32 %v464_v41  ;;  %v429_v48 = vmax.f32 %v427_v46, 1e-10  ;;  %v415_v49 = vmul.f32 %v1121_v44, %v1826_v63  ;;  %vm750_vm2 = vcmask 1040384  }
  0xe7   : > { %1130 = vrcp.f32 %v357_v45  ;;  %v345_v50 = vsel %vm344_vm12, %v1824_v62, %v343_v47 }
  0xe8   : > { %1132 = vrcp.f32 %v429_v48  ;;  %v348_v51 = vsel %vm346_vm13, %v347_v22, %v345_v50  ;;  %v417_v52 = vsel %vm416_vm14, %v1826_v63, %v415_v49 }
  0xe9   : > { %v356_v53 = vmax.f32 %v348_v51, 1e-10  ;;  %v420_v54 = vsel %vm418_vm15, %v419_v27, %v417_v52 }
  0xea   : > { %v428_v55 = vmax.f32 %v420_v54, 1e-10 }
  0xeb   : > { %1134 = vrcp.f32 %v356_v53 }
  0xec   : > { %1136 = vrcp.f32 %v428_v55 }
  0xed   : > { %v1123_v56 = vpop.eup %1122 }
  0xee   : > { %v1125_v57 = vpop.eup %1124  ;;  %v397_v58 = vmul.f32 %v1123_v56, %v1779_v0 }
  0xef   : > { %v1127_v59 = vpop.eup %1126  ;;  %v469_v60 = vmul.f32 %v1125_v57, %v1781_v1 }
  0xf0   : > { %v1129_v61 = vpop.eup %1128  ;;  %482 = vmatprep.subr.mxu0 %v397_v58  ;;  %v395_v62 = vmul.f32 %v1127_v59, %v1783_v2 }
  0xf1   : > { %v1131_v3 = vpop.eup %1130  ;;  %552 = vmatprep.subr.mxu1 %v469_v60  ;;  %v467_v63 = vmul.f32 %v1129_v61, %v1791_v6 }
  0xf2   : > { %v1133_v4 = vpop.eup %1132  ;;  %483 = vmatpush1.xpose.msra.mxu0 %v395_v62  ;;  %v361_v5 = vmul.f32 %v1131_v3, %v1795_v7  ;;  %v476_v9 = vadd.f32 %v397_v58, %v395_v62 }
  0xf3   : > { %553 = vmatpush1.xpose.msra.mxu1 %v467_v63  ;;  %v433_v10 = vmul.f32 %v1133_v4, %v1797_v8  ;;  %v479_v0 = vadd.f32 %v469_v60, %v467_v63 }
  0xf4   : > { %546 = vmatprep.mubr.f32.mxu0 %v361_v5  ;;  %477 = vadd.xlane.f32.xlu1 %v476_v9 }
  0xf5   : > { %v1135_v1 = vpop.eup %1134  ;;  %616 = vmatprep.mubr.f32.mxu1 %v433_v10 }
  0xf6   : > { %v1137_v11 = vpop.eup %1136  ;;  %v359_v2 = vmul.f32 %v1135_v1, %v1807_v12 }
  0xf7   : > { %v431_v14 = vmul.f32 %v1137_v11, %v1809_v13 }
  0xf8   : > { %547 = vmatmul.mubr.f32.vlgmr.msra.gmra.mrb[0].mxu0 %v359_v2  ;;  %v470_v6 = vadd.f32 %v361_v5, %v359_v2  ;;  %480 = vadd.xlane.f32.xlu1 %v479_v0 }
  0xf9   : > { %617 = vmatmul.mubr.f32.vlgmr.msra.gmra.mrb[0].mxu1 %v431_v14  ;;  %v473_v7 = vadd.f32 %v433_v10, %v431_v14 }
  0xfa   : > { %471 = vadd.xlane.f32.xlu0 %v470_v6 }
  0xfe   : > { %474 = vadd.xlane.f32.xlu0 %v473_v7 }
 0x181   : > { %v478_v15 = vpop.xlane.xlu1 %477 }
 0x182   : > { %v645_v17 = vmul.f32 %v478_v15, %v478_v15  ;;  %v706_v26 = vmul.f32 %v478_v15, %v395_v62  ;;  %v707_v27 = vmul.f32 %v478_v15, %v397_v58 }
 0x184   : > { %v646_v12 = vsel %vm623_vm0, %v645_v17, 0.0  ;;  %v708_v34 = vrot.slane %v706_v26, 4  ;;  %v714_v35 = vrot.slane %v707_v27, 4 }
 0x185   : > { %v481_v18 = vpop.xlane.xlu1 %480 }
 0x186   : > { %v657_v22 = vmul.f32 %v481_v18, %v478_v15  ;;  %v734_v30 = vmul.f32 %v481_v18, %v395_v62  ;;  %v735_v31 = vmul.f32 %v481_v18, %v397_v58  ;;  %v709_v42 = vadd.f32 %v708_v34, %v706_v26 }
 0x187   : > { %v472_v16 = vpop.xlane.xlu0 %471  ;;  %v715_v43 = vadd.f32 %v714_v35, %v707_v27 }
 0x188   : > { %v622_v8 = vmul.f32 %v472_v16, %v472_v16  ;;  %v658_v23 = vsel %vm623_vm0, %v657_v22, 0.0  ;;  %v692_v24 = vmul.f32 %v472_v16, %v359_v2  ;;  %v693_v25 = vmul.f32 %v472_v16, %v361_v5 }
 0x189   : > { %v736_v38 = vrot.slane %v734_v30, 4  ;;  %v742_v39 = vrot.slane %v735_v31, 4  ;;  %v710_v50 = vrot.slane %v709_v42, 2  ;;  %v716_v51 = vrot.slane %v715_v43, 2 }
 0x18a   : > { %v624_v20 = vsel %vm623_vm0, %v622_v8, 0.0  ;;  %v694_v32 = vrot.slane %v692_v24, 4  ;;  %v700_v33 = vrot.slane %v693_v25, 4 }
 0x18b   : > { %v475_v19 = vpop.xlane.xlu0 %474  ;;  %625 = vadd.xlane.f32.xlu0 %v624_v20  ;;  %v737_v46 = vadd.f32 %v736_v38, %v734_v30  ;;  %v743_v47 = vadd.f32 %v742_v39, %v735_v31  ;;  %v711_v58 = vadd.f32 %v710_v50, %v709_v42  ;;  %v717_v59 = vadd.f32 %v716_v51, %v715_v43 }
 0x18c   : > { %v634_v21 = vmul.f32 %v475_v19, %v472_v16  ;;  %v720_v28 = vmul.f32 %v475_v19, %v359_v2  ;;  %v721_v29 = vmul.f32 %v475_v19, %v361_v5  ;;  %v695_v40 = vadd.f32 %v694_v32, %v692_v24 }
 0x18d   : > { %v701_v41 = vadd.f32 %v700_v33, %v693_v25  ;;  %v738_v54 = vrot.slane %v737_v46, 2  ;;  %v744_v55 = vrot.slane %v743_v47, 2  ;;  %v712_v5 = vrot.slane %v711_v58, 1 }
 0x18e   : > { %v635_v13 = vsel %vm623_vm0, %v634_v21, 0.0  ;;  %v722_v36 = vrot.slane %v720_v28, 4  ;;  %v728_v37 = vrot.slane %v721_v29, 4  ;;  %v696_v48 = vrot.slane %v695_v40, 2 }
 0x18f   : > { %636 = vadd.xlane.f32.xlu1 %v635_v13  ;;  %647 = vadd.xlane.f32.xlu0 %v646_v12  ;;  %v702_v49 = vrot.slane %v701_v41, 2  ;;  %v739_v62 = vadd.f32 %v738_v54, %v737_v46  ;;  %v745_v3 = vadd.f32 %v744_v55, %v743_v47  ;;  %v718_v9 = vrot.slane %v717_v59, 1 }
 0x190   : > { %v723_v44 = vadd.f32 %v722_v36, %v720_v28  ;;  %v729_v45 = vadd.f32 %v728_v37, %v721_v29  ;;  %v697_v56 = vadd.f32 %v696_v48, %v695_v40  ;;  %v713_v6 = vadd.f32 %v712_v5, %v711_v58 }
 0x191   : > { %v703_v57 = vadd.f32 %v702_v49, %v701_v41  ;;  %v740_v1 = vrot.slane %v739_v62, 1  ;;  %v746_v11 = vrot.slane %v745_v3, 1  ;;  %v719_v7 = vadd.f32 %v718_v9, %v717_v59 }
 0x192   : > { %v724_v52 = vrot.slane %v723_v44, 2  ;;  %v730_v53 = vrot.slane %v729_v45, 2  ;;  %v698_v63 = vrot.slane %v697_v56, 1 }
 0x193   : > { %659 = vadd.xlane.f32.xlu1 %v658_v23  ;;  %v704_v4 = vrot.slane %v703_v57, 1  ;;  %v741_v8 = vadd.f32 %v740_v1, %v739_v62  ;;  %v747_v17 = vadd.f32 %v746_v11, %v745_v3 }
 0x194   : > { %v725_v60 = vadd.f32 %v724_v52, %v723_v44  ;;  %v731_v61 = vadd.f32 %v730_v53, %v729_v45  ;;  %v699_v2 = vadd.f32 %v698_v63, %v697_v56 }
 0x195   : > { %v705_v14 = vadd.f32 %v704_v4, %v703_v57 }
 0x196   : > { %v726_v10 = vrot.slane %v725_v60, 1  ;;  %v732_v0 = vrot.slane %v731_v61, 1  ;;  %v748_v18 = vmul.f32 %v713_v6, %v699_v2 }
 0x197   : > { %v749_v19 = vmul.f32 %v719_v7, %v705_v14 }
 0x198   : > { %v727_v15 = vadd.f32 %v726_v10, %v725_v60  ;;  %v733_v16 = vadd.f32 %v732_v0, %v731_v61  ;;  %v751_v27 = vsel %vm750_vm2, %v748_v18, 0.0 }
 0x199   : > { %v752_v28 = vsel %vm750_vm2, %v749_v19, 0.0 }
 0x19a   : > { %v765_v21 = vmul.f32 %v741_v8, %v727_v15  ;;  %v766_v12 = vmul.f32 %v747_v17, %v733_v16  ;;  %v753_v32 = vadd.f32 %v752_v28, %v751_v27 }
 0x19c   : > { %v767_v30 = vsel %vm750_vm2, %v765_v21, 0.0  ;;  %v768_v31 = vsel %vm750_vm2, %v766_v12, 0.0 }
 0x19d   : > { %v769_v33 = vadd.f32 %v768_v31, %v767_v30 }
 0x1cb   : > { %v548_v20 = vpop.f32.mrb[0].mxu0 }
 0x1cc   : > { %v669_v22 = vmul.f32 %v548_v20, %v548_v20  ;;  %v618_v13 = vpop.f32.mrb[0].mxu1  ;;  %v550_v23 = vpop.f32.mrb[1].mxu0 }
 0x1cd   : > { %v681_v24 = vmul.f32 %v618_v13, %v548_v20  ;;  %v620_v25 = vpop.f32.mrb[1].mxu1 }
 0x1ce   : > { %v671_v26 = vsel %vm670_vm1, %v669_v22, 0.0 }
 0x1cf   : > { %672 = vadd.xlane.f32.xlu0 %v671_v26  ;;  %v682_v29 = vsel %vm670_vm1, %v681_v24, 0.0 }
 0x1d0   : > { %683 = vadd.xlane.f32.xlu1 %v682_v29 }
 0x1d3   : > { %754 = vadd.xlane.f32.xlu0 %v753_v32 }
 0x1d4   : > { %770 = vadd.xlane.f32.xlu1 %v769_v33 }
 0x218   : > { %v626_v34 = vpop.xlane.xlu0 %625 }
 0x219   : > { %v627_v35 = vrot.slane %v626_v34, 4 }
 0x21b   : > { %v628_v36 = vadd.f32 %v627_v35, %v626_v34 }
 0x21c   : > { %v637_v37 = vpop.xlane.xlu1 %636  ;;  %v648_v38 = vpop.xlane.xlu0 %647 }
 0x21d   : > { %v638_v39 = vrot.slane %v637_v37, 4  ;;  %v629_v40 = vrot.slane %v628_v36, 2  ;;  %v649_v41 = vrot.slane %v648_v38, 4 }
 0x21f   : > { %v639_v42 = vadd.f32 %v638_v39, %v637_v37  ;;  %v650_v43 = vadd.f32 %v649_v41, %v648_v38  ;;  %v630_v44 = vadd.f32 %v629_v40, %v628_v36 }
 0x220   : > { %v660_v45 = vpop.xlane.xlu1 %659 }
 0x221   : > { %v640_v46 = vrot.slane %v639_v42, 2  ;;  %v661_v47 = vrot.slane %v660_v45, 4  ;;  %v651_v48 = vrot.slane %v650_v43, 2  ;;  %v631_v49 = vrot.slane %v630_v44, 1 }
 0x223   : > { %v662_v50 = vadd.f32 %v661_v47, %v660_v45  ;;  %v632_v51 = vadd.f32 %v631_v49, %v630_v44  ;;  %v641_v52 = vadd.f32 %v640_v46, %v639_v42  ;;  %v652_v53 = vadd.f32 %v651_v48, %v650_v43 }
 0x225   : > { %v663_v54 = vrot.slane %v662_v50, 2  ;;  %972 = vpush %v632_v51  ;;  %v642_v55 = vrot.slane %v641_v52, 1  ;;  %v653_v56 = vrot.slane %v652_v53, 1 }
 0x227   : > { %v643_v57 = vadd.f32 %v642_v55, %v641_v52  ;;  %v654_v58 = vadd.f32 %v653_v56, %v652_v53  ;;  %v664_v59 = vadd.f32 %v663_v54, %v662_v50 }
 0x229   : > { %974 = vpush %v643_v57  ;;  %v665_v60 = vrot.slane %v664_v59, 1 }
 0x22a   : > { %976 = vpush %v654_v58 }
 0x22b   : > { %v666_v61 = vadd.f32 %v665_v60, %v664_v59 }
 0x22d   : > { %978 = vpush %v666_v61 }
 0x256   : > { %s973_s25 = spop %972 }
 0x257   : > { %783 = sst [smem:[%s1888_s26]] %s973_s25 }
 0x25a   : > { %s975_s6 = spop %974 }
 0x25b   : > { %792 = sst [smem:[%s884_s5]] %s975_s6  ;;  %s977_s21 = spop %976 }
 0x25c   : > { %v673_v62 = vpop.xlane.xlu0 %672  ;;  %s656_s24 = ssub.f32 65536.0, %s977_s21  ;;  %s1993_s21 = sld [smem:[#allocation25_spill]] }
 0x25d   : > { %v684_v3 = vpop.xlane.xlu1 %683  ;;  %v674_v63 = vrot.slane %v673_v62, 4 }
 0x25e   : > { %v685_v4 = vrot.slane %v684_v3, 4  ;;  %786 = sst [smem:[%s878_s22]] %s656_s24  ;;  %s979_s19 = spop %978 }
 0x25f   : > { %v675_v5 = vadd.f32 %v674_v63, %v673_v62  ;;  %s668_s23 = ssub.f32 65536.0, %s979_s19 }
 0x260   : > { %v686_v9 = vadd.f32 %v685_v4, %v684_v3  ;;  %v755_v10 = vpop.xlane.xlu0 %754 }
 0x261   : > { %v676_v0 = vrot.slane %v675_v5, 2  ;;  %v771_v1 = vpop.xlane.xlu1 %770  ;;  %v756_v11 = vrot.slane %v755_v10, 4  ;;  %795 = sst [smem:[%s887_s28]] %s668_s23 }
 0x262   : > { %v687_v2 = vrot.slane %v686_v9, 2  ;;  %v772_v14 = vrot.slane %v771_v1, 4  ;;  %s1268_s24 = scalar_lea.hbm %s1993_s21, 32 }
 0x263   : > { %v757_v6 = vadd.f32 %v756_v11, %v755_v10  ;;  %v677_v7 = vadd.f32 %v676_v0, %v675_v5  ;;  %p1269_p1 = scmp.ne.s32.totalorder %s1993_s21, %s1268_s24  ;;  %p1274_p12 = scmp.lt.u32.totalorder %s1268_s24, %s1993_s21 }
 0x264   : > { %v773_v15 = vadd.f32 %v772_v14, %v771_v1  ;;  %v688_v16 = vadd.f32 %v687_v2, %v686_v9 }
 0x265   : > { %v758_v8 = vrot.slane %v757_v6, 2  ;;  %v678_v17 = vrot.slane %v677_v7, 1  ;;  %p1270_p3 = pnand %p1269_p1, %p1022_p10 }
 0x266   : > { %v774_v18 = vrot.slane %v773_v15, 2  ;;  %v689_v19 = vrot.slane %v688_v16, 1 }
 0x267   : > { %v759_v20 = vadd.f32 %v758_v8, %v757_v6  ;;  %v679_v21 = vadd.f32 %v678_v17, %v677_v7  ;;  %p1271_p5 = pneg %p1270_p3 }
 0x268   : > { %v775_v12 = vadd.f32 %v774_v18, %v773_v15  ;;  %v690_v22 = vadd.f32 %v689_v19, %v688_v16 }
 0x269   : > { %980 = vpush %v679_v21  ;;  %v760_v13 = vrot.slane %v759_v20, 1  ;;  %p1276_p2 = pnand %p1274_p12, %p1271_p5 }
 0x26a   : > { %982 = vpush %v690_v22  ;;  %v776_v23 = vrot.slane %v775_v12, 1 }
 0x26b   : > { %v761_v24 = vadd.f32 %v760_v13, %v759_v20 }
 0x26c   : > { %v777_v25 = vadd.f32 %v776_v23, %v775_v12 }
 0x26d   : > { %984 = vpush %v761_v24 }
 0x26e   : > { %986 = vpush %v777_v25 }
 0x29a   : > { %s981_s20 = spop %980 }
 0x29b   : > { %s983_s11 = spop %982 }
 0x29e   : > { %s985_s14 = spop %984 }
 0x29f   : > { %s763_s2 = smul.f32 0.00390625, %s985_s14  ;;  %s987_s8 = spop %986 }
 0x2a0   : > { %s779_s16 = smul.f32 0.00390625, %s987_s8 }
 0x2a1   : > { %s764_s25 = ssub.f32 %s763_s2, %s981_s20 }
 0x2a2   : > { %s780_s5 = ssub.f32 %s779_s16, %s983_s11 }
 0x2a3   : > { %789 = sst [smem:[%s881_s15]] %s764_s25 }
 0x2a4   : > { %798 = sst [smem:[%s890_s18]] %s780_s5 }
 0x2a5   : > { %1279 = shalt.err (!%p1276_p2)
}
 0x2a6   : > { %s1387_s26 = smov [#allocation12]  }
 0x2a7   : > { %1001 = dma.smem_to_hbm (%p1022_p10), %s1387_s26, 32, %s1993_s21, [#allocation6]  }
 0x2a8   : > { %1339 = dma.done.wait (%p1022_p10), [#allocation6], 32  }
 0x2a9   : > { %1341 = vsyncadd (%p1022_p10), [#allocation6], 4294967264 }
 0x2aa   : > { %812 = sfence }
 0x2ab PF: > { %s1994_s15 = sld [smem:[#allocation23_spill]]  ;;  %p26_p9 = scmp.ge.s32.totalorder %s1482_s13, 4  }
 0x2ac   : > { %s1995_s28 = smov %s1348_s29  ;;  %s1996_s29 = smov %s1352_s30 }
 0x2ad   : > { %s1997_s30 = smov %s1702_s17  ;;  %s1998_s6 = smov %s1360_s7 }
 0x2ae   : > { %s1999_s7 = smov %s1364_s0  ;;  %s2000_s0 = smov %s1621_s27 }
 0x2af   : > { %s2001_s8 = smov %s1372_s9  ;;  %s2002_s9 = smov %s1376_s10 }
 0x2b0   : > { %s2004_s11 = smov %s1482_s13  ;;  %28 = sbr.rel (!%p26_p9) target bundleno = 24 (0x18), region = 116 }
 0x2b1   : > { %s2003_s10 = smov %s1994_s15 }
 0x2b7   :  { %818 = vsyncpa [#allocation5], 1 }
 0x2b8   :  { %820 = vsyncpa [#allocation5 + $0x1], 1 }
 0x2b9   :  { %821 = vsyncpa [#allocation8], 1 }
 0x2ba   :  { %823 = vsyncpa [#allocation8 + $0x1], 1 }
 0x2bb   :  { %824 = vsyncpa [#allocation11], 1 }
 0x2bc   :  { %826 = vsyncpa [#allocation11 + $0x1], 1 }
 0x2bd   :  { %827 = vsyncpa [#allocation6], 1 }
 0x2be   :  { %829 = vsyncpa [#allocation6 + $0x1], 1 }

</bundles_post_ra>
